<compile_context>
chip_gen: v7x
topology: tpu7x:2x2x1
jax: 0.10.0
libtpu: 0.0.40
codegen_flags: <defaults>
</compile_context>

<pallas_src>
import jax
import jax.numpy as jnp
from jax.experimental import pallas as pl
from jax.experimental.pallas import tpu as pltpu

HI = jax.lax.Precision.HIGHEST  # used only for the pure-JAX reference / prep


def bilstm_kernel(x_ref, packed_ref, whh_f_ref, wfc_ref, out_ref):
    # x_ref      : (Bt, T, 1) f32
    # packed_ref : (8, 128)   f32  rows: 0=v_f, 1=u_f, 2=v_b, 3=u_b, 4=fc_bias
    # whh_f_ref  : (H, 4H)    bf16
    # wfc_ref    : (2H, O)    bf16 (rows 0..H-1 -> forward h, H..2H-1 -> reverse h)
    Bt, T, _ = x_ref.shape
    H = whh_f_ref.shape[0]
    O = out_ref.shape[1]

    packed = packed_ref[...]                 # one small load, static row slices
    v_f = packed[0:1, :4 * H]                # (1, 4H)
    u_f = packed[1:2, :4 * H]
    v_b = packed[2:3, :4 * H]
    u_b = packed[3:4, :4 * H]
    bfc = packed[4:5, :O]                    # (1, O)

    whh_f = whh_f_ref[...]                   # (H, 4H) bf16
    x3 = x_ref[...]                          # (Bt, T, 1) f32

    # Hoisted input-gate contributions (Scalar2Vec fused into the LSTM input
    # projection):  gx_all[b, t, :] = x[b, t] * v_f + u_f.
    # One fused broadcast FMA over the whole block; pure VPU, independent of
    # the recurrence, so the scheduler can overlap it freely.
    gx_all = x3 * v_f[None, :, :] + u_f[None, :, :]          # (Bt, T, 4H) f32

    def gate_act(gates, c_prev):
        # Two full-vreg EUP calls (sigmoid, tanh over all 4H lanes) instead of
        # four quarter-vreg calls; 32-lane extraction happens afterwards.
        sig = jax.nn.sigmoid(gates)
        th = jnp.tanh(gates)
        i = sig[:, 0 * H:1 * H]
        f = sig[:, 1 * H:2 * H]
        g = th[:, 2 * H:3 * H]
        o = sig[:, 3 * H:4 * H]
        c_new = i * g if c_prev is None else f * c_prev + i * g
        h_new = o * jnp.tanh(c_new)
        return h_new, c_new

    # Forward direction, fully unrolled.  Step 0 starts from the zero state so
    # its recurrent matmul (0 @ whh) and forget-gate term are skipped.
    h, c = gate_act(gx_all[:, 0, :], None)
    for t in range(1, T):
        gates = gx_all[:, t, :] + jnp.dot(h.astype(jnp.bfloat16), whh_f,
                                          preferred_element_type=jnp.float32)
        h, c = gate_act(gates, c)

    # Reverse direction: out[:, -1, H:] of a PyTorch bi-LSTM is the reverse
    # hidden after exactly one step over x[:, T-1] from the zero state, so
    # there is no recurrent matmul (h0 = 0) and no forget-gate term (c0 = 0).
    h_b, _ = gate_act(x3[:, T - 1, :] * v_b + u_b, None)

    # fc on concat([h_fwd, h_bwd]) as two small matmuls over static slices of
    # the single stacked fc weight.
    wfc = wfc_ref[...]                       # (2H, O) bf16
    out_ref[...] = (
        jnp.dot(h.astype(jnp.bfloat16), wfc[:H, :],
                preferred_element_type=jnp.float32)
        + jnp.dot(h_b.astype(jnp.bfloat16), wfc[H:, :],
                  preferred_element_type=jnp.float32)
        + bfc)


def _pick_b_tile(B):
    if B <= 8:
        return B
    for cand in (512, 256, 128, 64, 32, 16, 8):
        if B % cand == 0:
            return cand
    return B  # fallback: whole batch in one tile


def bilstm_forward(x, kp):
    B, T = x.shape
    H = kp["whh_f"].shape[0]
    O = kp["wfc"].shape[1]
    b_tile = _pick_b_tile(B)
    grid = (B // b_tile,)

    x3 = x.astype(jnp.float32)[:, :, None]   # (B, T, 1)

    return pl.pallas_call(
        bilstm_kernel,
        out_shape=jax.ShapeDtypeStruct((B, O), jnp.float32),
        grid=grid,
        in_specs=[
            pl.BlockSpec((b_tile, T, 1), lambda i: (i, 0, 0)),
            pl.BlockSpec((8, 128), lambda i: (0, 0)),
            pl.BlockSpec((H, 4 * H), lambda i: (0, 0)),
            pl.BlockSpec((2 * H, O), lambda i: (0, 0)),
        ],
        out_specs=pl.BlockSpec((b_tile, O), lambda i: (i, 0)),
        compiler_params=pltpu.CompilerParams(
            dimension_semantics=("parallel",)),
    )(x3, kp["packed"], kp["whh_f"], kp["wfc"])


def reference_forward(x, pt):
    """Pure-JAX re-implementation of the PyTorch forward (full bi-LSTM, f32)."""
    x = x.astype(jnp.float32)
    x_embed = x[:, :, None] * pt["emb_weight"][:, 0][None, None, :] \
        + pt["emb_bias"][None, None, :]                     # (B, T, E)
    B, T, _ = x_embed.shape
    H = pt["w_hh_f"].shape[1]

    def run_dir(xs, w_ih, w_hh, b_ih, b_hh):
        h = jnp.zeros((B, H), jnp.float32)
        c = jnp.zeros((B, H), jnp.float32)
        outs = []
        for t in range(xs.shape[1]):
            xt = xs[:, t, :]
            gates = (jnp.dot(xt, w_ih.T, precision=HI) + b_ih
                     + jnp.dot(h, w_hh.T, precision=HI) + b_hh)
            i = jax.nn.sigmoid(gates[:, :H])
            f = jax.nn.sigmoid(gates[:, H:2 * H])
            g = jnp.tanh(gates[:, 2 * H:3 * H])
            o = jax.nn.sigmoid(gates[:, 3 * H:])
            c = f * c + i * g
            h = o * jnp.tanh(c)
            outs.append(h)
        return jnp.stack(outs, axis=1)

    out_f = run_dir(x_embed, pt["w_ih_f"], pt["w_hh_f"],
                    pt["b_ih_f"], pt["b_hh_f"])
    out_b = run_dir(x_embed[:, ::-1, :], pt["w_ih_b"], pt["w_hh_b"],
                    pt["b_ih_b"], pt["b_hh_b"])[:, ::-1, :]
    last = jnp.concatenate([out_f, out_b], axis=-1)[:, -1, :]
    return jnp.dot(last, pt["fc_weight"].T, precision=HI) + pt["fc_bias"]


def make_params(key, embed_dim, hidden_size, output_size):
    E, H, O = embed_dim, hidden_size, output_size
    assert 4 * H <= 128 and O <= 128, "packed-parameter layout assumes 4H, O <= 128"
    ks = jax.random.split(key, 12)

    def init(k, shape, scale=0.1):
        return scale * jax.random.normal(k, shape, dtype=jnp.float32)

    # PyTorch-shaped parameters.
    pt = dict(
        emb_weight=init(ks[0], (E, 1)), emb_bias=init(ks[1], (E,)),
        w_ih_f=init(ks[2], (4 * H, E)), w_hh_f=init(ks[3], (4 * H, H)),
        b_ih_f=init(ks[4], (4 * H,)), b_hh_f=init(ks[5], (4 * H,)),
        w_ih_b=init(ks[6], (4 * H, E)), w_hh_b=init(ks[7], (4 * H, H)),
        b_ih_b=init(ks[8], (4 * H,)), b_hh_b=init(ks[9], (4 * H,)),
        fc_weight=init(ks[10], (O, 2 * H)), fc_bias=init(ks[11], (O,)),
    )

    # Kernel-layout parameters: Scalar2Vec folded into the LSTM input
    # projection (rank-1 precompute, done once in f32), weights pre-transposed
    # so the kernel does plain `h @ W` matmuls; MXU operands pre-cast to bf16;
    # all tiny vectors packed into one (8, 128) block.
    def fuse(w_ih, b_ih, b_hh):
        v = jnp.dot(pt["emb_weight"][:, 0], w_ih.T, precision=HI)        # (4H,)
        u = jnp.dot(pt["emb_bias"], w_ih.T, precision=HI) + b_ih + b_hh  # (4H,)
        return v, u

    vf, uf = fuse(pt["w_ih_f"], pt["b_ih_f"], pt["b_hh_f"])
    vb, ub = fuse(pt["w_ih_b"], pt["b_ih_b"], pt["b_hh_b"])

    packed = jnp.zeros((8, 128), jnp.float32)
    packed = packed.at[0, :4 * H].set(vf)
    packed = packed.at[1, :4 * H].set(uf)
    packed = packed.at[2, :4 * H].set(vb)
    packed = packed.at[3, :4 * H].set(ub)
    packed = packed.at[4, :O].set(pt["fc_bias"])

    kp = dict(
        packed=packed,                                        # (8, 128) f32
        whh_f=pt["w_hh_f"].T.astype(jnp.bfloat16),            # (H, 4H) bf16
        wfc=pt["fc_weight"].T.astype(jnp.bfloat16),           # (2H, O) bf16
    )
    return pt, kp


if __name__ == "__main__":
    # Small, module-consistent shapes.
    B, T = 2, 8                # batch, seq (== input_features: one scalar each)
    embed_dim = 32
    hidden_size = 32
    num_layers = 1             # see NOTE above: module only valid for 1 layer
    output_size = 8

    key = jax.random.PRNGKey(0)
    kx, kw = jax.random.split(key)
    x = jax.random.normal(kx, (B, T), dtype=jnp.float32)

    pt_params, kern_params = make_params(kw, embed_dim, hidden_size, output_size)

    out = bilstm_forward(x, kern_params)
    out = jax.block_until_ready(out)

    ref = jax.block_until_ready(reference_forward(x, pt_params))
    assert out.shape == (B, output_size)
    # Tolerance accounts for bf16 MXU operands vs the f32 HIGHEST-precision
    # reference.
    assert jnp.allclose(out, ref, rtol=5e-3, atol=5e-3), \
        f"mismatch: max abs diff {jnp.max(jnp.abs(out - ref))}"

    print("KERNEL_OK")
</pallas_src>

<mosaic_0001>
module attributes {stable_mosaic.version = 11 : i64} {
  func.func @bilstm_kernel(%arg0: i32, %arg1: memref<2x8x1xf32, #tpu.memory_space<vmem>>, %arg2: memref<8x128xf32, #tpu.memory_space<vmem>>, %arg3: memref<32x128xbf16, #tpu.memory_space<vmem>>, %arg4: memref<64x8xbf16, #tpu.memory_space<vmem>>, %arg5: memref<2x8xf32, #tpu.memory_space<vmem>>) attributes {dimension_semantics = [#tpu.dimension_semantics<parallel>], iteration_bounds = array<i64: 1>, scalar_prefetch = 0 : i64, scratch_operands = 0 : i64, tpu.core_type = #tpu.core_type<tc>, window_params = [{transform_indices = @transform_0, window_bounds = array<i64: 2, 8, 1>}, {pipeline_mode = #tpu.pipeline_mode<synchronous>, transform_indices = @transform_1, window_bounds = array<i64: 8, 128>}, {pipeline_mode = #tpu.pipeline_mode<synchronous>, transform_indices = @transform_2, window_bounds = array<i64: 32, 128>}, {pipeline_mode = #tpu.pipeline_mode<synchronous>, transform_indices = @transform_3, window_bounds = array<i64: 64, 8>}, {transform_indices = @transform_4, window_bounds = array<i64: 2, 8>}]} {
    %c0 = arith.constant 0 : index
    %c0_0 = arith.constant 0 : index
    %0 = vector.load %arg2[%c0, %c0_0] : memref<8x128xf32, #tpu.memory_space<vmem>>, vector<8x128xf32>
    %1 = vector.extract_strided_slice %0 {offsets = [0, 0], sizes = [1, 128], strides = [1, 1]} : vector<8x128xf32> to vector<1x128xf32>
    %2 = vector.extract_strided_slice %0 {offsets = [1, 0], sizes = [1, 128], strides = [1, 1]} : vector<8x128xf32> to vector<1x128xf32>
    %3 = vector.extract_strided_slice %0 {offsets = [2, 0], sizes = [1, 128], strides = [1, 1]} : vector<8x128xf32> to vector<1x128xf32>
    %4 = vector.extract_strided_slice %0 {offsets = [3, 0], sizes = [1, 128], strides = [1, 1]} : vector<8x128xf32> to vector<1x128xf32>
    %5 = vector.extract_strided_slice %0 {offsets = [4, 0], sizes = [1, 8], strides = [1, 1]} : vector<8x128xf32> to vector<1x8xf32>
    %c0_1 = arith.constant 0 : index
    %c0_2 = arith.constant 0 : index
    %6 = vector.load %arg3[%c0_1, %c0_2] : memref<32x128xbf16, #tpu.memory_space<vmem>>, vector<32x128xbf16>
    %c0_3 = arith.constant 0 : index
    %c0_4 = arith.constant 0 : index
    %c0_5 = arith.constant 0 : index
    %7 = vector.load %arg1[%c0_3, %c0_4, %c0_5] : memref<2x8x1xf32, #tpu.memory_space<vmem>>, vector<2x8x1xf32>
    %8 = vector.shape_cast %1 : vector<1x128xf32> to vector<1x1x128xf32>
    %9 = vector.broadcast %7 : vector<2x8x1xf32> to vector<2x8x128xf32>
    %10 = vector.broadcast %8 : vector<1x1x128xf32> to vector<2x8x128xf32>
    %11 = arith.mulf %9, %10 : vector<2x8x128xf32>
    %12 = vector.shape_cast %2 : vector<1x128xf32> to vector<1x1x128xf32>
    %13 = vector.broadcast %12 : vector<1x1x128xf32> to vector<2x8x128xf32>
    %14 = arith.addf %11, %13 : vector<2x8x128xf32>
    %15 = vector.extract_strided_slice %14 {offsets = [0, 0, 0], sizes = [2, 1, 128], strides = [1, 1, 1]} : vector<2x8x128xf32> to vector<2x1x128xf32>
    %16 = vector.shape_cast %15 : vector<2x1x128xf32> to vector<2x128xf32>
    %17 = arith.negf %16 : vector<2x128xf32>
    %18 = math.exp %17 : vector<2x128xf32>
    %cst = arith.constant 1.000000e+00 : f32
    %19 = vector.broadcast %cst : f32 to vector<2x128xf32>
    %20 = arith.addf %19, %18 : vector<2x128xf32>
    %21 = arith.divf %19, %20 : vector<2x128xf32>
    %22 = math.tanh %16 : vector<2x128xf32>
    %23 = vector.extract_strided_slice %21 {offsets = [0, 0], sizes = [2, 32], strides = [1, 1]} : vector<2x128xf32> to vector<2x32xf32>
    %24 = vector.extract_strided_slice %22 {offsets = [0, 64], sizes = [2, 32], strides = [1, 1]} : vector<2x128xf32> to vector<2x32xf32>
    %25 = vector.extract_strided_slice %21 {offsets = [0, 96], sizes = [2, 32], strides = [1, 1]} : vector<2x128xf32> to vector<2x32xf32>
    %26 = arith.mulf %23, %24 : vector<2x32xf32>
    %27 = math.tanh %26 : vector<2x32xf32>
    %28 = arith.mulf %25, %27 : vector<2x32xf32>
    %29 = vector.extract_strided_slice %14 {offsets = [0, 1, 0], sizes = [2, 1, 128], strides = [1, 1, 1]} : vector<2x8x128xf32> to vector<2x1x128xf32>
    %30 = vector.shape_cast %29 : vector<2x1x128xf32> to vector<2x128xf32>
    %31 = arith.truncf %28 : vector<2x32xf32> to vector<2x32xbf16>
    %cst_6 = arith.constant dense<0.000000e+00> : vector<2x128xf32>
    %32 = tpu.matmul %31, %6, %cst_6 {dimension_numbers = #tpu.dot_dimension_numbers<[1], [0], [0], [1], [0, 0, 1, 1], [], []>} : vector<2x32xbf16>, vector<32x128xbf16>, vector<2x128xf32> -> vector<2x128xf32>
    %33 = arith.addf %30, %32 : vector<2x128xf32>
    %34 = arith.negf %33 : vector<2x128xf32>
    %35 = math.exp %34 : vector<2x128xf32>
    %cst_7 = arith.constant 1.000000e+00 : f32
    %36 = vector.broadcast %cst_7 : f32 to vector<2x128xf32>
    %37 = arith.addf %36, %35 : vector<2x128xf32>
    %38 = arith.divf %36, %37 : vector<2x128xf32>
    %39 = math.tanh %33 : vector<2x128xf32>
    %40 = vector.extract_strided_slice %38 {offsets = [0, 0], sizes = [2, 32], strides = [1, 1]} : vector<2x128xf32> to vector<2x32xf32>
    %41 = vector.extract_strided_slice %38 {offsets = [0, 32], sizes = [2, 32], strides = [1, 1]} : vector<2x128xf32> to vector<2x32xf32>
    %42 = vector.extract_strided_slice %39 {offsets = [0, 64], sizes = [2, 32], strides = [1, 1]} : vector<2x128xf32> to vector<2x32xf32>
    %43 = vector.extract_strided_slice %38 {offsets = [0, 96], sizes = [2, 32], strides = [1, 1]} : vector<2x128xf32> to vector<2x32xf32>
    %44 = arith.mulf %41, %26 : vector<2x32xf32>
    %45 = arith.mulf %40, %42 : vector<2x32xf32>
    %46 = arith.addf %44, %45 : vector<2x32xf32>
    %47 = math.tanh %46 : vector<2x32xf32>
    %48 = arith.mulf %43, %47 : vector<2x32xf32>
    %49 = vector.extract_strided_slice %14 {offsets = [0, 2, 0], sizes = [2, 1, 128], strides = [1, 1, 1]} : vector<2x8x128xf32> to vector<2x1x128xf32>
    %50 = vector.shape_cast %49 : vector<2x1x128xf32> to vector<2x128xf32>
    %51 = arith.truncf %48 : vector<2x32xf32> to vector<2x32xbf16>
    %cst_8 = arith.constant dense<0.000000e+00> : vector<2x128xf32>
    %52 = tpu.matmul %51, %6, %cst_8 {dimension_numbers = #tpu.dot_dimension_numbers<[1], [0], [0], [1], [0, 0, 1, 1], [], []>} : vector<2x32xbf16>, vector<32x128xbf16>, vector<2x128xf32> -> vector<2x128xf32>
    %53 = arith.addf %50, %52 : vector<2x128xf32>
    %54 = arith.negf %53 : vector<2x128xf32>
    %55 = math.exp %54 : vector<2x128xf32>
    %cst_9 = arith.constant 1.000000e+00 : f32
    %56 = vector.broadcast %cst_9 : f32 to vector<2x128xf32>
    %57 = arith.addf %56, %55 : vector<2x128xf32>
    %58 = arith.divf %56, %57 : vector<2x128xf32>
    %59 = math.tanh %53 : vector<2x128xf32>
    %60 = vector.extract_strided_slice %58 {offsets = [0, 0], sizes = [2, 32], strides = [1, 1]} : vector<2x128xf32> to vector<2x32xf32>
    %61 = vector.extract_strided_slice %58 {offsets = [0, 32], sizes = [2, 32], strides = [1, 1]} : vector<2x128xf32> to vector<2x32xf32>
    %62 = vector.extract_strided_slice %59 {offsets = [0, 64], sizes = [2, 32], strides = [1, 1]} : vector<2x128xf32> to vector<2x32xf32>
    %63 = vector.extract_strided_slice %58 {offsets = [0, 96], sizes = [2, 32], strides = [1, 1]} : vector<2x128xf32> to vector<2x32xf32>
    %64 = arith.mulf %61, %46 : vector<2x32xf32>
    %65 = arith.mulf %60, %62 : vector<2x32xf32>
    %66 = arith.addf %64, %65 : vector<2x32xf32>
    %67 = math.tanh %66 : vector<2x32xf32>
    %68 = arith.mulf %63, %67 : vector<2x32xf32>
    %69 = vector.extract_strided_slice %14 {offsets = [0, 3, 0], sizes = [2, 1, 128], strides = [1, 1, 1]} : vector<2x8x128xf32> to vector<2x1x128xf32>
    %70 = vector.shape_cast %69 : vector<2x1x128xf32> to vector<2x128xf32>
    %71 = arith.truncf %68 : vector<2x32xf32> to vector<2x32xbf16>
    %cst_10 = arith.constant dense<0.000000e+00> : vector<2x128xf32>
    %72 = tpu.matmul %71, %6, %cst_10 {dimension_numbers = #tpu.dot_dimension_numbers<[1], [0], [0], [1], [0, 0, 1, 1], [], []>} : vector<2x32xbf16>, vector<32x128xbf16>, vector<2x128xf32> -> vector<2x128xf32>
    %73 = arith.addf %70, %72 : vector<2x128xf32>
    %74 = arith.negf %73 : vector<2x128xf32>
    %75 = math.exp %74 : vector<2x128xf32>
    %cst_11 = arith.constant 1.000000e+00 : f32
    %76 = vector.broadcast %cst_11 : f32 to vector<2x128xf32>
    %77 = arith.addf %76, %75 : vector<2x128xf32>
    %78 = arith.divf %76, %77 : vector<2x128xf32>
    %79 = math.tanh %73 : vector<2x128xf32>
    %80 = vector.extract_strided_slice %78 {offsets = [0, 0], sizes = [2, 32], strides = [1, 1]} : vector<2x128xf32> to vector<2x32xf32>
    %81 = vector.extract_strided_slice %78 {offsets = [0, 32], sizes = [2, 32], strides = [1, 1]} : vector<2x128xf32> to vector<2x32xf32>
    %82 = vector.extract_strided_slice %79 {offsets = [0, 64], sizes = [2, 32], strides = [1, 1]} : vector<2x128xf32> to vector<2x32xf32>
    %83 = vector.extract_strided_slice %78 {offsets = [0, 96], sizes = [2, 32], strides = [1, 1]} : vector<2x128xf32> to vector<2x32xf32>
    %84 = arith.mulf %81, %66 : vector<2x32xf32>
    %85 = arith.mulf %80, %82 : vector<2x32xf32>
    %86 = arith.addf %84, %85 : vector<2x32xf32>
    %87 = math.tanh %86 : vector<2x32xf32>
    %88 = arith.mulf %83, %87 : vector<2x32xf32>
    %89 = vector.extract_strided_slice %14 {offsets = [0, 4, 0], sizes = [2, 1, 128], strides = [1, 1, 1]} : vector<2x8x128xf32> to vector<2x1x128xf32>
    %90 = vector.shape_cast %89 : vector<2x1x128xf32> to vector<2x128xf32>
    %91 = arith.truncf %88 : vector<2x32xf32> to vector<2x32xbf16>
    %cst_12 = arith.constant dense<0.000000e+00> : vector<2x128xf32>
    %92 = tpu.matmul %91, %6, %cst_12 {dimension_numbers = #tpu.dot_dimension_numbers<[1], [0], [0], [1], [0, 0, 1, 1], [], []>} : vector<2x32xbf16>, vector<32x128xbf16>, vector<2x128xf32> -> vector<2x128xf32>
    %93 = arith.addf %90, %92 : vector<2x128xf32>
    %94 = arith.negf %93 : vector<2x128xf32>
    %95 = math.exp %94 : vector<2x128xf32>
    %cst_13 = arith.constant 1.000000e+00 : f32
    %96 = vector.broadcast %cst_13 : f32 to vector<2x128xf32>
    %97 = arith.addf %96, %95 : vector<2x128xf32>
    %98 = arith.divf %96, %97 : vector<2x128xf32>
    %99 = math.tanh %93 : vector<2x128xf32>
    %100 = vector.extract_strided_slice %98 {offsets = [0, 0], sizes = [2, 32], strides = [1, 1]} : vector<2x128xf32> to vector<2x32xf32>
    %101 = vector.extract_strided_slice %98 {offsets = [0, 32], sizes = [2, 32], strides = [1, 1]} : vector<2x128xf32> to vector<2x32xf32>
    %102 = vector.extract_strided_slice %99 {offsets = [0, 64], sizes = [2, 32], strides = [1, 1]} : vector<2x128xf32> to vector<2x32xf32>
    %103 = vector.extract_strided_slice %98 {offsets = [0, 96], sizes = [2, 32], strides = [1, 1]} : vector<2x128xf32> to vector<2x32xf32>
    %104 = arith.mulf %101, %86 : vector<2x32xf32>
    %105 = arith.mulf %100, %102 : vector<2x32xf32>
    %106 = arith.addf %104, %105 : vector<2x32xf32>
    %107 = math.tanh %106 : vector<2x32xf32>
    %108 = arith.mulf %103, %107 : vector<2x32xf32>
    %109 = vector.extract_strided_slice %14 {offsets = [0, 5, 0], sizes = [2, 1, 128], strides = [1, 1, 1]} : vector<2x8x128xf32> to vector<2x1x128xf32>
    %110 = vector.shape_cast %109 : vector<2x1x128xf32> to vector<2x128xf32>
    %111 = arith.truncf %108 : vector<2x32xf32> to vector<2x32xbf16>
    %cst_14 = arith.constant dense<0.000000e+00> : vector<2x128xf32>
    %112 = tpu.matmul %111, %6, %cst_14 {dimension_numbers = #tpu.dot_dimension_numbers<[1], [0], [0], [1], [0, 0, 1, 1], [], []>} : vector<2x32xbf16>, vector<32x128xbf16>, vector<2x128xf32> -> vector<2x128xf32>
    %113 = arith.addf %110, %112 : vector<2x128xf32>
    %114 = arith.negf %113 : vector<2x128xf32>
    %115 = math.exp %114 : vector<2x128xf32>
    %cst_15 = arith.constant 1.000000e+00 : f32
    %116 = vector.broadcast %cst_15 : f32 to vector<2x128xf32>
    %117 = arith.addf %116, %115 : vector<2x128xf32>
    %118 = arith.divf %116, %117 : vector<2x128xf32>
    %119 = math.tanh %113 : vector<2x128xf32>
    %120 = vector.extract_strided_slice %118 {offsets = [0, 0], sizes = [2, 32], strides = [1, 1]} : vector<2x128xf32> to vector<2x32xf32>
    %121 = vector.extract_strided_slice %118 {offsets = [0, 32], sizes = [2, 32], strides = [1, 1]} : vector<2x128xf32> to vector<2x32xf32>
    %122 = vector.extract_strided_slice %119 {offsets = [0, 64], sizes = [2, 32], strides = [1, 1]} : vector<2x128xf32> to vector<2x32xf32>
    %123 = vector.extract_strided_slice %118 {offsets = [0, 96], sizes = [2, 32], strides = [1, 1]} : vector<2x128xf32> to vector<2x32xf32>
    %124 = arith.mulf %121, %106 : vector<2x32xf32>
    %125 = arith.mulf %120, %122 : vector<2x32xf32>
    %126 = arith.addf %124, %125 : vector<2x32xf32>
    %127 = math.tanh %126 : vector<2x32xf32>
    %128 = arith.mulf %123, %127 : vector<2x32xf32>
    %129 = vector.extract_strided_slice %14 {offsets = [0, 6, 0], sizes = [2, 1, 128], strides = [1, 1, 1]} : vector<2x8x128xf32> to vector<2x1x128xf32>
    %130 = vector.shape_cast %129 : vector<2x1x128xf32> to vector<2x128xf32>
    %131 = arith.truncf %128 : vector<2x32xf32> to vector<2x32xbf16>
    %cst_16 = arith.constant dense<0.000000e+00> : vector<2x128xf32>
    %132 = tpu.matmul %131, %6, %cst_16 {dimension_numbers = #tpu.dot_dimension_numbers<[1], [0], [0], [1], [0, 0, 1, 1], [], []>} : vector<2x32xbf16>, vector<32x128xbf16>, vector<2x128xf32> -> vector<2x128xf32>
    %133 = arith.addf %130, %132 : vector<2x128xf32>
    %134 = arith.negf %133 : vector<2x128xf32>
    %135 = math.exp %134 : vector<2x128xf32>
    %cst_17 = arith.constant 1.000000e+00 : f32
    %136 = vector.broadcast %cst_17 : f32 to vector<2x128xf32>
    %137 = arith.addf %136, %135 : vector<2x128xf32>
    %138 = arith.divf %136, %137 : vector<2x128xf32>
    %139 = math.tanh %133 : vector<2x128xf32>
    %140 = vector.extract_strided_slice %138 {offsets = [0, 0], sizes = [2, 32], strides = [1, 1]} : vector<2x128xf32> to vector<2x32xf32>
    %141 = vector.extract_strided_slice %138 {offsets = [0, 32], sizes = [2, 32], strides = [1, 1]} : vector<2x128xf32> to vector<2x32xf32>
    %142 = vector.extract_strided_slice %139 {offsets = [0, 64], sizes = [2, 32], strides = [1, 1]} : vector<2x128xf32> to vector<2x32xf32>
    %143 = vector.extract_strided_slice %138 {offsets = [0, 96], sizes = [2, 32], strides = [1, 1]} : vector<2x128xf32> to vector<2x32xf32>
    %144 = arith.mulf %141, %126 : vector<2x32xf32>
    %145 = arith.mulf %140, %142 : vector<2x32xf32>
    %146 = arith.addf %144, %145 : vector<2x32xf32>
    %147 = math.tanh %146 : vector<2x32xf32>
    %148 = arith.mulf %143, %147 : vector<2x32xf32>
    %149 = vector.extract_strided_slice %14 {offsets = [0, 7, 0], sizes = [2, 1, 128], strides = [1, 1, 1]} : vector<2x8x128xf32> to vector<2x1x128xf32>
    %150 = vector.shape_cast %149 : vector<2x1x128xf32> to vector<2x128xf32>
    %151 = arith.truncf %148 : vector<2x32xf32> to vector<2x32xbf16>
    %cst_18 = arith.constant dense<0.000000e+00> : vector<2x128xf32>
    %152 = tpu.matmul %151, %6, %cst_18 {dimension_numbers = #tpu.dot_dimension_numbers<[1], [0], [0], [1], [0, 0, 1, 1], [], []>} : vector<2x32xbf16>, vector<32x128xbf16>, vector<2x128xf32> -> vector<2x128xf32>
    %153 = arith.addf %150, %152 : vector<2x128xf32>
    %154 = arith.negf %153 : vector<2x128xf32>
    %155 = math.exp %154 : vector<2x128xf32>
    %cst_19 = arith.constant 1.000000e+00 : f32
    %156 = vector.broadcast %cst_19 : f32 to vector<2x128xf32>
    %157 = arith.addf %156, %155 : vector<2x128xf32>
    %158 = arith.divf %156, %157 : vector<2x128xf32>
    %159 = math.tanh %153 : vector<2x128xf32>
    %160 = vector.extract_strided_slice %158 {offsets = [0, 0], sizes = [2, 32], strides = [1, 1]} : vector<2x128xf32> to vector<2x32xf32>
    %161 = vector.extract_strided_slice %158 {offsets = [0, 32], sizes = [2, 32], strides = [1, 1]} : vector<2x128xf32> to vector<2x32xf32>
    %162 = vector.extract_strided_slice %159 {offsets = [0, 64], sizes = [2, 32], strides = [1, 1]} : vector<2x128xf32> to vector<2x32xf32>
    %163 = vector.extract_strided_slice %158 {offsets = [0, 96], sizes = [2, 32], strides = [1, 1]} : vector<2x128xf32> to vector<2x32xf32>
    %164 = arith.mulf %161, %146 : vector<2x32xf32>
    %165 = arith.mulf %160, %162 : vector<2x32xf32>
    %166 = arith.addf %164, %165 : vector<2x32xf32>
    %167 = math.tanh %166 : vector<2x32xf32>
    %168 = arith.mulf %163, %167 : vector<2x32xf32>
    %169 = vector.extract_strided_slice %7 {offsets = [0, 7, 0], sizes = [2, 1, 1], strides = [1, 1, 1]} : vector<2x8x1xf32> to vector<2x1x1xf32>
    %170 = vector.shape_cast %169 : vector<2x1x1xf32> to vector<2x1xf32>
    %171 = vector.broadcast %170 : vector<2x1xf32> to vector<2x128xf32>
    %172 = vector.broadcast %3 : vector<1x128xf32> to vector<2x128xf32>
    %173 = arith.mulf %171, %172 : vector<2x128xf32>
    %174 = vector.broadcast %4 : vector<1x128xf32> to vector<2x128xf32>
    %175 = arith.addf %173, %174 : vector<2x128xf32>
    %176 = arith.negf %175 : vector<2x128xf32>
    %177 = math.exp %176 : vector<2x128xf32>
    %cst_20 = arith.constant 1.000000e+00 : f32
    %178 = vector.broadcast %cst_20 : f32 to vector<2x128xf32>
    %179 = arith.addf %178, %177 : vector<2x128xf32>
    %180 = arith.divf %178, %179 : vector<2x128xf32>
    %181 = math.tanh %175 : vector<2x128xf32>
    %182 = vector.extract_strided_slice %180 {offsets = [0, 0], sizes = [2, 32], strides = [1, 1]} : vector<2x128xf32> to vector<2x32xf32>
    %183 = vector.extract_strided_slice %181 {offsets = [0, 64], sizes = [2, 32], strides = [1, 1]} : vector<2x128xf32> to vector<2x32xf32>
    %184 = vector.extract_strided_slice %180 {offsets = [0, 96], sizes = [2, 32], strides = [1, 1]} : vector<2x128xf32> to vector<2x32xf32>
    %185 = arith.mulf %182, %183 : vector<2x32xf32>
    %186 = math.tanh %185 : vector<2x32xf32>
    %187 = arith.mulf %184, %186 : vector<2x32xf32>
    %c0_21 = arith.constant 0 : index
    %c0_22 = arith.constant 0 : index
    %188 = vector.load %arg4[%c0_21, %c0_22] : memref<64x8xbf16, #tpu.memory_space<vmem>>, vector<64x8xbf16>
    %189 = arith.truncf %168 : vector<2x32xf32> to vector<2x32xbf16>
    %190 = vector.extract_strided_slice %188 {offsets = [0, 0], sizes = [32, 8], strides = [1, 1]} : vector<64x8xbf16> to vector<32x8xbf16>
    %cst_23 = arith.constant dense<0.000000e+00> : vector<2x8xf32>
    %191 = tpu.matmul %189, %190, %cst_23 {dimension_numbers = #tpu.dot_dimension_numbers<[1], [0], [0], [1], [0, 0, 1, 1], [], []>} : vector<2x32xbf16>, vector<32x8xbf16>, vector<2x8xf32> -> vector<2x8xf32>
    %192 = arith.truncf %187 : vector<2x32xf32> to vector<2x32xbf16>
    %193 = vector.extract_strided_slice %188 {offsets = [32, 0], sizes = [32, 8], strides = [1, 1]} : vector<64x8xbf16> to vector<32x8xbf16>
    %cst_24 = arith.constant dense<0.000000e+00> : vector<2x8xf32>
    %194 = tpu.matmul %192, %193, %cst_24 {dimension_numbers = #tpu.dot_dimension_numbers<[1], [0], [0], [1], [0, 0, 1, 1], [], []>} : vector<2x32xbf16>, vector<32x8xbf16>, vector<2x8xf32> -> vector<2x8xf32>
    %195 = arith.addf %191, %194 : vector<2x8xf32>
    %196 = vector.broadcast %5 : vector<1x8xf32> to vector<2x8xf32>
    %197 = arith.addf %195, %196 : vector<2x8xf32>
    %c0_25 = arith.constant 0 : index
    %c0_26 = arith.constant 0 : index
    %198 = vector.load %arg5[%c0_25, %c0_26] : memref<2x8xf32, #tpu.memory_space<vmem>>, vector<2x8xf32>
    tpu.vector_store %arg5[%c0_25, %c0_26], %197 {strides = array<i32>} : memref<2x8xf32, #tpu.memory_space<vmem>>, vector<2x8xf32>,
    return
  }
  func.func @transform_0(%arg0: i32) -> (i32, i32, i32) {
    %c0_i32 = arith.constant 0 : i32
    %c0_i32_0 = arith.constant 0 : i32
    %c0_i32_1 = arith.constant 0 : i32
    return %arg0, %c0_i32, %c0_i32_0 : i32, i32, i32
  }
  func.func @transform_1(%arg0: i32) -> (i32, i32) {
    %c0_i32 = arith.constant 0 : i32
    %c0_i32_0 = arith.constant 0 : i32
    %c0_i32_1 = arith.constant 0 : i32
    return %c0_i32, %c0_i32_0 : i32, i32
  }
  func.func @transform_2(%arg0: i32) -> (i32, i32) {
    %c0_i32 = arith.constant 0 : i32
    %c0_i32_0 = arith.constant 0 : i32
    %c0_i32_1 = arith.constant 0 : i32
    return %c0_i32, %c0_i32_0 : i32, i32
  }
  func.func @transform_3(%arg0: i32) -> (i32, i32) {
    %c0_i32 = arith.constant 0 : i32
    %c0_i32_0 = arith.constant 0 : i32
    %c0_i32_1 = arith.constant 0 : i32
    return %c0_i32, %c0_i32_0 : i32, i32
  }
  func.func @transform_4(%arg0: i32) -> (i32, i32) {
    %c0_i32 = arith.constant 0 : i32
    %c0_i32_0 = arith.constant 0 : i32
    return %arg0, %c0_i32 : i32, i32
  }
}

</mosaic_0001>

<bundles_post_ra>
// kernel: tpu_custom_call.1
= control target key start
LH: loop header
LB: loop body
LE: loop exit
PB: predicated region body
PF: predicated region fallthrough
CT: control target
= control target key end

     0   :  { %v1437_v1 = vmov 0   ;;  %s1727_s0 = inlined_call_operand.vmem [shape: f32[2,8,1], index: 0, kind: input, shape index: {}]   ;;  %s1728_s1 = inlined_call_operand.vmem [shape: f32[8,128], index: 1, kind: input, shape index: {}]   ;;  %s1729_s2 = inlined_call_operand.vmem [shape: bf16[32,128], index: 2, kind: input, shape index: {}]   ;;  %s1730_s3 = inlined_call_operand.vmem [shape: bf16[64,8], index: 3, kind: input, shape index: {}]   ;;  %s1731_s4 = inlined_call_operand.hbm [shape: f32[2,8], index: 4, kind: output, shape index: {}]  }
   0x1   :  { %v25_v0 = vld [vmem:[%s1727_s0 + $0x8] sm:$0xff]  ;;  %1261 = vset.pattern.permute.xlu0 %v1437_v1  ;;  %v24_v2 = vld [vmem:[%s1727_s0] sm:$0xff] }
   0x2   :  { %33 = vperm.xlu0 %1261, %v25_v0  }
   0x6   :  { %28 = vperm.xlu0 %1261, %v24_v2  }
   0x7   :  { %9 = vsyncpa [#allocation3], 0  ;;  %v36_v3 = vlaneseq  ;;  %v1481_v6 = vld [vmem:[%s1728_s1] sm:$0xff]  ;;  %s1438_s0 = smov 64   ;;  %s1439_s21 = smov 96   ;;  %v1440_v32 = vmov 0.0  }
   0x8   :  { %v1509_v31 = vld [vmem:[%s1729_s2] sm:$0xff]   ;;  %1182 = vmatprep.subr.bf16.mxu0 %v1440_v32  ;;  %vm1441_vm0 = vmmov 0   ;;  %v1518_v33 = vld [vmem:[%s1729_s2 + $0x8] sm:$0xff]   ;;  %1190 = vmatprep.subr.bf16.mxu1 %v1440_v32  ;;  %vm91_vm1 = vcmask 1041409   ;;  %s1442_s2 = smov 32   ;;  %vm108_vm2 = vcmask 261120  }
   0x9   :  { %v1475_v4 = vshrl.u32 %v36_v3, 7  ;;  %1186 = vmatprep.mubr.msk.bf16.mxu0 %vm1441_vm0, %v1440_v32  ;;  %1183 = vmatpush3.bf16.msra.mxu0 %v1509_v31  ;;  %s1443_s9 = smov [#allocation2]   ;;  %vm1106_vm3 = vcmask 58368  }
   0xa   :  { %1184 = vmatprep.subr.bf16.mxu0 %v1440_v32  ;;  %1191 = vmatpush3.bf16.msra.mxu1 %v1509_v31  ;;  %s1114_s10 = sshll.u32 %s1443_s9, 4  ;;  %s1115_s10 = int_to_ptr.vmem [resolvable:$true] %s1114_s10 }
   0xb   :  { %v38_v5 = vsub.s32 0, %v1475_v4  ;;  %v44_v7 = vsub.s32 1, %v1475_v4  ;;  %1192 = vmatprep.subr.bf16.mxu1 %v1440_v32  ;;  %1194 = vmatprep.mubr.msk.bf16.mxu1 %vm1441_vm0, %v1440_v32  ;;  %s1413_s11 = scalar_lea.vmem %s1115_s10, 32  ;;  %p1418_p1 = scmp.lt.s32.totalorder %s1115_s10, %s1115_s10 }
   0xc   :  { %p1414_p0 = scmp.ne.s32.totalorder %s1115_s10, %s1413_s11  ;;  %p1419_p2 = scmp.lt.s32.totalorder %s1413_s11, %s1413_s11 }
   0xd   :  { %v39_v8 = vrot.slane %v1481_v6, %v38_v5  ;;  %v45_v9 = vrot.slane %v1481_v6, %v44_v7  ;;  %1185 = vmatpush3.bf16.msra.mxu0 %v1518_v33 }
   0xe   :  { %1193 = vmatpush3.bf16.msra.mxu1 %v1518_v33  ;;  %1198 = vmatprep.subr.bf16.mxu0 %v1440_v32  ;;  %p1420_p3 = por %p1419_p2, %p1418_p1 }
   0xf   :  { %1206 = vmatprep.subr.bf16.mxu1 %v1440_v32 }
  0x10   :  { %p1421_p4 = pnand %p1420_p3, %p1414_p0 }
  0x81   :  { %v1486_v10 = vpop.permute.xlu0 %33 }
  0x82   :  { %v41_v11 = vmul.f32 %v39_v8, %v1486_v10 }
  0x84   :  { %v1489_v12 = vadd.f32 %v45_v9, %v41_v11 }
  0x85   :  { %v1491_v13 = vpop.permute.xlu0 %28 }
  0x86   :  { %v40_v14 = vmul.f32 %v39_v8, %v1491_v13  ;;  %1268 = vtanh.f32 %v1489_v12  ;;  %v1123_v18 = vmul.f32 -1.442695, %v1489_v12 }
  0x88   :  { %v1495_v15 = vadd.f32 %v45_v9, %v40_v14 }
  0x8a   :  { %1270 = vtanh.f32 %v1495_v15  ;;  %v1122_v19 = vmul.f32 -1.442695, %v1495_v15 }
  0x8b   :  { %1272 = vpow2.f32 %v1123_v18 }
  0x8c   :  { %1274 = vpow2.f32 %v1122_v19 }
  0x90   :  { %v1269_v16 = vpop.eup %1268 }
  0x91   :  { %66 = vrot.lane.b32.xlu1 %v1269_v16, %s1438_s0 }
  0x94   :  { %v1271_v17 = vpop.eup %1270 }
  0x95   :  { %64 = vrot.lane.b32.xlu1 %v1271_v17, %s1438_s0  ;;  %v1273_v20 = vpop.eup %1272 }
  0x96   :  { %v55_v21 = vadd.f32 1.0, %v1273_v20  ;;  %v1275_v22 = vpop.eup %1274 }
  0x97   :  { %v54_v23 = vadd.f32 1.0, %v1275_v22 }
  0x98   :  { %1276 = vrcp.f32 %v55_v21 }
  0x99   :  { %1278 = vrcp.f32 %v54_v23 }
  0xa2   :  { %v1277_v24 = vpop.eup %1276 }
  0xa3   :  { %v1279_v27 = vpop.eup %1278 }
 0x103   :  { %v67_v25 = vpop.permute.xlu1 %66 }
 0x104   :  { %v1502_v26 = vmul.f32 %v1277_v24, %v67_v25 }
 0x106   :  { %1280 = vtanh.f32 %v1502_v26  ;;  %v175_v56 = vrot.slane %v1502_v26, 7 }
 0x107   :  { %v65_v28 = vpop.permute.xlu1 %64 }
 0x108   :  { %v70_v29 = vmul.f32 %v1279_v27, %v65_v28 }
 0x10a   :  { %1282 = vtanh.f32 %v70_v29  ;;  %v174_v57 = vrot.slane %v70_v29, 7 }
 0x110   :  { %v1281_v30 = vpop.eup %1280 }
 0x111   :  { %78 = vrot.lane.b32.xlu0 %v1281_v30, %s1439_s21 }
 0x114   :  { %v1283_v34 = vpop.eup %1282 }
 0x115   :  { %76 = vrot.lane.b32.xlu1 %v1283_v34, %s1439_s21 }
 0x183   :  { %v79_v35 = vpop.permute.xlu0 %78 }
 0x184   :  { %v83_v36 = vmul.f32 %v1277_v24, %v79_v35 }
 0x186   :  { %v85_v37 = vpack.c.bf16 %v83_v36, %v83_v36 }
 0x187   :  { %v77_v38 = vpop.permute.xlu1 %76 }
 0x188   :  { %v89_v39 = vunpack.c.l.b16 %v85_v37  ;;  %v82_v40 = vmul.f32 %v1279_v27, %v77_v38 }
 0x18a   :  { %v84_v41 = vpack.c.bf16 %v82_v40, %v82_v40  ;;  %v90_v42 = vrot.slane %v89_v39, 7 }
 0x18c   :  { %v88_v43 = vunpack.c.l.b16 %v84_v41 }
 0x18e   :  { %v92_v44 = vsel %vm91_vm1, %v90_v42, %v88_v43 }
 0x18f   :  { %v93_v45 = vpack.c.b16 %v92_v44, %v92_v44 }
 0x191   :  { %94 = vrot.lane.b32.xlu0 %v93_v45, %s1442_s2 }
 0x203   :  { %v95_v46 = vpop.permute.xlu0 %94 }
 0x204   :  { %1187 = vmatmul.mubr.msk.bf16.vlgmr.msra.gmra.mrb[0].mxu0 %vm108_vm2, %v95_v46 }
 0x205   :  { %1199 = vmatpush3.bf16.msra.mxu0 %v1509_v31  ;;  %1202 = vmatprep.mubr.msk.bf16.mxu0 %vm1441_vm0, %v1440_v32 }
 0x206   :  { %1200 = vmatprep.subr.bf16.mxu0 %v1440_v32 }
 0x209   :  { %1201 = vmatpush3.bf16.msra.mxu0 %v1518_v33 }
 0x20a   :  { %1214 = vmatprep.subr.bf16.mxu0 %v1440_v32 }
 0x2d7   :  { %v146_v47 = vpop.f32.mrb[0].mxu0 }
 0x2d8   :  { %v153_v48 = vrot.slane %v146_v47, 7  ;;  %v157_v49 = vadd.f32 %v146_v47, %v1489_v12  ;;  %v1188_v50 = vpop.f32.mrb[1].mxu0 }
 0x2d9   :  { %v149_v51 = vpop.f32.mrb[2].mxu0 }
 0x2da   :  { %v156_v52 = vadd.f32 %v153_v48, %v1495_v15  ;;  %1284 = vtanh.f32 %v157_v49  ;;  %v1189_v53 = vpop.f32.mrb[3].mxu0  ;;  %v1128_v58 = vmul.f32 -1.442695, %v157_v49 }
 0x2dc   :  { %1286 = vtanh.f32 %v156_v52  ;;  %v1127_v59 = vmul.f32 -1.442695, %v156_v52 }
 0x2dd   :  { %1288 = vpow2.f32 %v1128_v58 }
 0x2de   :  { %1290 = vpow2.f32 %v1127_v59 }
 0x2e4   :  { %v1285_v54 = vpop.eup %1284 }
 0x2e5   :  { %188 = vrot.lane.b32.xlu0 %v1285_v54, %s1438_s0 }
 0x2e6   :  { %v1287_v55 = vpop.eup %1286 }
 0x2e7   :  { %186 = vrot.lane.b32.xlu1 %v1287_v55, %s1438_s0  ;;  %v1289_v60 = vpop.eup %1288 }
 0x2e8   :  { %v1291_v61 = vpop.eup %1290  ;;  %v165_v62 = vadd.f32 1.0, %v1289_v60 }
 0x2e9   :  { %178 = vrot.lane.b32.xlu0 %v175_v56, %s1442_s2  ;;  %v164_v63 = vadd.f32 1.0, %v1291_v61 }
 0x2ea   :  { %1292 = vrcp.f32 %v165_v62 }
 0x2eb   :  { %176 = vrot.lane.b32.xlu1 %v174_v57, %s1442_s2  ;;  %1294 = vrcp.f32 %v164_v63 }
 0x2f4   :  { %v1293_v0 = vpop.eup %1292 }
 0x2f5   :  { %v1295_v3 = vpop.eup %1294 }
 0x357   :  { %v189_v1 = vpop.permute.xlu0 %188 }
 0x358   :  { %v193_v2 = vmul.f32 %v1293_v0, %v189_v1 }
 0x359   :  { %v187_v5 = vpop.permute.xlu1 %186 }
 0x35a   :  { %198 = vrot.lane.b32.xlu0 %v193_v2, %s1442_s2  ;;  %v192_v7 = vmul.f32 %v1295_v3, %v187_v5 }
 0x35b   :  { %v179_v8 = vpop.permute.xlu0 %178 }
 0x35c   :  { %196 = vrot.lane.b32.xlu1 %v192_v7, %s1442_s2  ;;  %v183_v9 = vmul.f32 %v1293_v0, %v179_v8 }
 0x35d   :  { %v177_v11 = vpop.permute.xlu1 %176 }
 0x35e   :  { %v182_v17 = vmul.f32 %v1295_v3, %v177_v11 }
 0x3cc   :  { %v199_v14 = vpop.permute.xlu0 %198 }
 0x3cd   :  { %v1549_v16 = vadd.f32 %v199_v14, %v183_v9 }
 0x3ce   :  { %v197_v18 = vpop.permute.xlu1 %196 }
 0x3cf   :  { %1296 = vtanh.f32 %v1549_v16  ;;  %v202_v19 = vadd.f32 %v197_v18, %v182_v17  ;;  %v294_v60 = vrot.slane %v1549_v16, 7 }
 0x3d1   :  { %1298 = vtanh.f32 %v202_v19  ;;  %v293_v59 = vrot.slane %v202_v19, 7 }
 0x3d9   :  { %v1297_v20 = vpop.eup %1296 }
 0x3da   :  { %210 = vrot.lane.b32.xlu0 %v1297_v20, %s1438_s0 }
 0x3db   :  { %v1299_v21 = vpop.eup %1298 }
 0x3dc   :  { %208 = vrot.lane.b32.xlu1 %v1299_v21, %s1438_s0 }
 0x44c   :  { %v211_v22 = vpop.permute.xlu0 %210 }
 0x44d   :  { %v215_v23 = vmul.f32 %v1293_v0, %v211_v22 }
 0x44e   :  { %v209_v24 = vpop.permute.xlu1 %208 }
 0x44f   :  { %v214_v25 = vmul.f32 %v1295_v3, %v209_v24  ;;  %v217_v26 = vpack.c.bf16 %v215_v23, %v215_v23 }
 0x451   :  { %v216_v27 = vpack.c.bf16 %v214_v25, %v214_v25  ;;  %v221_v29 = vunpack.c.l.b16 %v217_v26 }
 0x453   :  { %v220_v28 = vunpack.c.l.b16 %v216_v27 }
 0x455   :  { %v222_v30 = vrot.slane %v220_v28, 1 }
 0x457   :  { %v223_v34 = vsel %vm91_vm1, %v221_v29, %v222_v30 }
 0x458   :  { %v224_v35 = vpack.c.b16 %v223_v34, %v223_v34 }
 0x45a   :  { %225 = vrot.lane.b32.xlu1 %v224_v35, %s1442_s2 }
 0x4cc   :  { %v226_v36 = vpop.permute.xlu1 %225 }
 0x4cd   :  { %1195 = vmatmul.mubr.msk.bf16.vlgmr.msra.gmra.mrb[0].mxu1 %vm108_vm2, %v226_v36 }
 0x4ce   :  { %1207 = vmatpush3.bf16.msra.mxu1 %v1509_v31  ;;  %1210 = vmatprep.mubr.msk.bf16.mxu1 %vm1441_vm0, %v1440_v32 }
 0x4cf   :  { %1208 = vmatprep.subr.bf16.mxu1 %v1440_v32 }
 0x4d2   :  { %1209 = vmatpush3.bf16.msra.mxu1 %v1518_v33 }
 0x4d3   :  { %1222 = vmatprep.subr.bf16.mxu1 %v1440_v32 }
 0x5a0   :  { %v264_v37 = vpop.f32.mrb[0].mxu1 }
 0x5a1   :  { %v271_v38 = vrot.slane %v264_v37, 6  ;;  %v272_v39 = vrot.slane %v264_v37, 7  ;;  %v1196_v40 = vpop.f32.mrb[1].mxu1 }
 0x5a2   :  { %v267_v41 = vpop.f32.mrb[2].mxu1 }
 0x5a3   :  { %v275_v42 = vadd.f32 %v271_v38, %v1495_v15  ;;  %v276_v43 = vadd.f32 %v272_v39, %v1489_v12  ;;  %v1197_v44 = vpop.f32.mrb[3].mxu1 }
 0x5a5   :  { %1300 = vtanh.f32 %v275_v42  ;;  %v1130_v47 = vmul.f32 -1.442695, %v275_v42  ;;  %v1131_v48 = vmul.f32 -1.442695, %v276_v43 }
 0x5a6   :  { %1302 = vtanh.f32 %v276_v43 }
 0x5a7   :  { %1304 = vpow2.f32 %v1130_v47 }
 0x5a8   :  { %1306 = vpow2.f32 %v1131_v48 }
 0x5af   :  { %v1301_v45 = vpop.eup %1300 }
 0x5b0   :  { %v1303_v46 = vpop.eup %1302  ;;  %301 = vrot.lane.b32.xlu0 %v1301_v45, %s1438_s0 }
 0x5b1   :  { %303 = vrot.lane.b32.xlu1 %v1303_v46, %s1438_s0  ;;  %v1305_v49 = vpop.eup %1304 }
 0x5b2   :  { %v1307_v50 = vpop.eup %1306  ;;  %v283_v51 = vadd.f32 1.0, %v1305_v49 }
 0x5b3   :  { %v284_v52 = vadd.f32 1.0, %v1307_v50 }
 0x5b4   :  { %1308 = vrcp.f32 %v283_v51 }
 0x5b5   :  { %1310 = vrcp.f32 %v284_v52 }
 0x5be   :  { %v1309_v53 = vpop.eup %1308 }
 0x5bf   :  { %v1311_v55 = vpop.eup %1310  ;;  %v297_v61 = vmul.f32 %v1309_v53, %v293_v59 }
 0x5c0   :  { %v298_v62 = vmul.f32 %v1311_v55, %v294_v60 }
 0x622   :  { %v302_v54 = vpop.permute.xlu0 %301 }
 0x623   :  { %v304_v56 = vpop.permute.xlu1 %303  ;;  %v307_v57 = vmul.f32 %v1309_v53, %v302_v54 }
 0x624   :  { %v308_v58 = vmul.f32 %v1311_v55, %v304_v56 }
 0x625   :  { %311 = vrot.lane.b32.xlu0 %v307_v57, %s1442_s2 }
 0x626   :  { %313 = vrot.lane.b32.xlu1 %v308_v58, %s1442_s2 }
 0x697   :  { %v312_v63 = vpop.permute.xlu0 %311 }
 0x698   :  { %v314_v0 = vpop.permute.xlu1 %313  ;;  %v1570_v1 = vadd.f32 %v312_v63, %v297_v61 }
 0x699   :  { %v1572_v2 = vadd.f32 %v314_v0, %v298_v62 }
 0x69a   :  { %1312 = vtanh.f32 %v1570_v1  ;;  %v409_v49 = vrot.slane %v1570_v1, 7 }
 0x69b   :  { %1314 = vtanh.f32 %v1572_v2  ;;  %v410_v50 = vrot.slane %v1572_v2, 7 }
 0x6a4   :  { %v1313_v3 = vpop.eup %1312 }
 0x6a5   :  { %v1315_v5 = vpop.eup %1314  ;;  %323 = vrot.lane.b32.xlu0 %v1313_v3, %s1438_s0 }
 0x6a6   :  { %325 = vrot.lane.b32.xlu1 %v1315_v5, %s1438_s0 }
 0x717   :  { %v324_v7 = vpop.permute.xlu0 %323 }
 0x718   :  { %v326_v8 = vpop.permute.xlu1 %325  ;;  %v329_v9 = vmul.f32 %v1309_v53, %v324_v7 }
 0x719   :  { %v330_v11 = vmul.f32 %v1311_v55, %v326_v8 }
 0x71a   :  { %v331_v14 = vpack.c.bf16 %v329_v9, %v329_v9 }
 0x71b   :  { %v332_v16 = vpack.c.bf16 %v330_v11, %v330_v11 }
 0x71c   :  { %v335_v17 = vunpack.c.l.b16 %v331_v14 }
 0x71d   :  { %v336_v18 = vunpack.c.l.b16 %v332_v16 }
 0x71e   :  { %v337_v19 = vrot.slane %v335_v17, 2 }
 0x71f   :  { %v338_v20 = vrot.slane %v336_v18, 1 }
 0x721   :  { %v339_v21 = vsel %vm91_vm1, %v338_v20, %v337_v19 }
 0x722   :  { %v340_v22 = vpack.c.b16 %v339_v21, %v339_v21 }
 0x724   :  { %341 = vrot.lane.b32.xlu0 %v340_v22, %s1442_s2 }
 0x796   :  { %v342_v23 = vpop.permute.xlu0 %341 }
 0x797   :  { %1203 = vmatmul.mubr.msk.bf16.vlgmr.msra.gmra.mrb[4].mxu0 %vm108_vm2, %v342_v23 }
 0x798   :  { %1215 = vmatpush3.bf16.msra.mxu0 %v1509_v31  ;;  %1218 = vmatprep.mubr.msk.bf16.mxu0 %vm1441_vm0, %v1440_v32 }
 0x799   :  { %1216 = vmatprep.subr.bf16.mxu0 %v1440_v32 }
 0x79c   :  { %1217 = vmatpush3.bf16.msra.mxu0 %v1518_v33 }
 0x79d   :  { %1230 = vmatprep.subr.bf16.mxu0 %v1440_v32 }
 0x86a   :  { %v380_v24 = vpop.f32.mrb[4].mxu0 }
 0x86b   :  { %v387_v25 = vrot.slane %v380_v24, 5  ;;  %v388_v26 = vrot.slane %v380_v24, 6  ;;  %v1204_v27 = vpop.f32.mrb[5].mxu0 }
 0x86c   :  { %v383_v28 = vpop.f32.mrb[6].mxu0 }
 0x86d   :  { %v391_v29 = vadd.f32 %v387_v25, %v1495_v15  ;;  %v392_v30 = vadd.f32 %v388_v26, %v1489_v12  ;;  %v1205_v34 = vpop.f32.mrb[7].mxu0 }
 0x86f   :  { %1316 = vtanh.f32 %v391_v29  ;;  %v1133_v37 = vmul.f32 -1.442695, %v391_v29  ;;  %v1134_v38 = vmul.f32 -1.442695, %v392_v30 }
 0x870   :  { %1318 = vtanh.f32 %v392_v30 }
 0x871   :  { %1320 = vpow2.f32 %v1133_v37 }
 0x872   :  { %1322 = vpow2.f32 %v1134_v38 }
 0x879   :  { %v1317_v35 = vpop.eup %1316 }
 0x87a   :  { %v1319_v36 = vpop.eup %1318  ;;  %417 = vrot.lane.b32.xlu1 %v1317_v35, %s1438_s0 }
 0x87b   :  { %419 = vrot.lane.b32.xlu0 %v1319_v36, %s1438_s0  ;;  %v1321_v39 = vpop.eup %1320 }
 0x87c   :  { %v1323_v40 = vpop.eup %1322  ;;  %v399_v41 = vadd.f32 1.0, %v1321_v39 }
 0x87d   :  { %v400_v42 = vadd.f32 1.0, %v1323_v40 }
 0x87e   :  { %1324 = vrcp.f32 %v399_v41 }
 0x87f   :  { %1326 = vrcp.f32 %v400_v42 }
 0x888   :  { %v1325_v43 = vpop.eup %1324 }
 0x889   :  { %v1327_v45 = vpop.eup %1326  ;;  %v413_v51 = vmul.f32 %v1325_v43, %v409_v49 }
 0x88a   :  { %v414_v52 = vmul.f32 %v1327_v45, %v410_v50 }
 0x8ec   :  { %v418_v44 = vpop.permute.xlu1 %417 }
 0x8ed   :  { %v420_v46 = vpop.permute.xlu0 %419  ;;  %v423_v47 = vmul.f32 %v1325_v43, %v418_v44 }
 0x8ee   :  { %v424_v48 = vmul.f32 %v1327_v45, %v420_v46 }
 0x8ef   :  { %427 = vrot.lane.b32.xlu1 %v423_v47, %s1442_s2 }
 0x8f0   :  { %429 = vrot.lane.b32.xlu0 %v424_v48, %s1442_s2 }
 0x961   :  { %v428_v53 = vpop.permute.xlu1 %427 }
 0x962   :  { %v430_v54 = vpop.permute.xlu0 %429  ;;  %v1595_v55 = vadd.f32 %v428_v53, %v413_v51 }
 0x963   :  { %v1597_v56 = vadd.f32 %v430_v54, %v414_v52 }
 0x964   :  { %1328 = vtanh.f32 %v1595_v55  ;;  %v525_v39 = vrot.slane %v1595_v55, 7 }
 0x965   :  { %1330 = vtanh.f32 %v1597_v56  ;;  %v526_v40 = vrot.slane %v1597_v56, 7 }
 0x96e   :  { %v1329_v57 = vpop.eup %1328 }
 0x96f   :  { %v1331_v58 = vpop.eup %1330  ;;  %439 = vrot.lane.b32.xlu1 %v1329_v57, %s1438_s0 }
 0x970   :  { %441 = vrot.lane.b32.xlu0 %v1331_v58, %s1438_s0 }
 0x9e1   :  { %v440_v59 = vpop.permute.xlu1 %439 }
 0x9e2   :  { %v442_v60 = vpop.permute.xlu0 %441  ;;  %v445_v61 = vmul.f32 %v1325_v43, %v440_v59 }
 0x9e3   :  { %v446_v62 = vmul.f32 %v1327_v45, %v442_v60 }
 0x9e4   :  { %v447_v63 = vpack.c.bf16 %v445_v61, %v445_v61 }
 0x9e5   :  { %v448_v0 = vpack.c.bf16 %v446_v62, %v446_v62 }
 0x9e6   :  { %v451_v1 = vunpack.c.l.b16 %v447_v63 }
 0x9e7   :  { %v452_v2 = vunpack.c.l.b16 %v448_v0 }
 0x9e8   :  { %v453_v3 = vrot.slane %v451_v1, 3 }
 0x9e9   :  { %v454_v5 = vrot.slane %v452_v2, 2 }
 0x9eb   :  { %v455_v7 = vsel %vm91_vm1, %v454_v5, %v453_v3 }
 0x9ec   :  { %v456_v8 = vpack.c.b16 %v455_v7, %v455_v7 }
 0x9ee   :  { %457 = vrot.lane.b32.xlu1 %v456_v8, %s1442_s2 }
 0xa60   :  { %v458_v9 = vpop.permute.xlu1 %457 }
 0xa61   :  { %1211 = vmatmul.mubr.msk.bf16.vlgmr.msra.gmra.mrb[4].mxu1 %vm108_vm2, %v458_v9 }
 0xa62   :  { %1223 = vmatpush3.bf16.msra.mxu1 %v1509_v31  ;;  %1226 = vmatprep.mubr.msk.bf16.mxu1 %vm1441_vm0, %v1440_v32 }
 0xa63   :  { %1224 = vmatprep.subr.bf16.mxu1 %v1440_v32 }
 0xa66   :  { %1225 = vmatpush3.bf16.msra.mxu1 %v1518_v33 }
 0xa67   :  { %1238 = vmatprep.subr.bf16.mxu1 %v1440_v32 }
 0xb34   :  { %v496_v11 = vpop.f32.mrb[4].mxu1 }
 0xb35   :  { %v503_v14 = vrot.slane %v496_v11, 4  ;;  %v504_v16 = vrot.slane %v496_v11, 5  ;;  %v1212_v17 = vpop.f32.mrb[5].mxu1 }
 0xb36   :  { %v499_v18 = vpop.f32.mrb[6].mxu1 }
 0xb37   :  { %v507_v19 = vadd.f32 %v503_v14, %v1495_v15  ;;  %v508_v20 = vadd.f32 %v504_v16, %v1489_v12  ;;  %v1213_v21 = vpop.f32.mrb[7].mxu1 }
 0xb39   :  { %1332 = vtanh.f32 %v507_v19  ;;  %v1136_v24 = vmul.f32 -1.442695, %v507_v19  ;;  %v1137_v25 = vmul.f32 -1.442695, %v508_v20 }
 0xb3a   :  { %1334 = vtanh.f32 %v508_v20 }
 0xb3b   :  { %1336 = vpow2.f32 %v1136_v24 }
 0xb3c   :  { %1338 = vpow2.f32 %v1137_v25 }
 0xb43   :  { %v1333_v22 = vpop.eup %1332 }
 0xb44   :  { %v1335_v23 = vpop.eup %1334  ;;  %533 = vrot.lane.b32.xlu0 %v1333_v22, %s1438_s0 }
 0xb45   :  { %535 = vrot.lane.b32.xlu1 %v1335_v23, %s1438_s0  ;;  %v1337_v26 = vpop.eup %1336 }
 0xb46   :  { %v1339_v27 = vpop.eup %1338  ;;  %v515_v28 = vadd.f32 1.0, %v1337_v26 }
 0xb47   :  { %v516_v29 = vadd.f32 1.0, %v1339_v27 }
 0xb48   :  { %1340 = vrcp.f32 %v515_v28 }
 0xb49   :  { %1342 = vrcp.f32 %v516_v29 }
 0xb52   :  { %v1341_v30 = vpop.eup %1340 }
 0xb53   :  { %v1343_v35 = vpop.eup %1342  ;;  %v529_v41 = vmul.f32 %v1341_v30, %v525_v39 }
 0xb54   :  { %v530_v42 = vmul.f32 %v1343_v35, %v526_v40 }
 0xbb6   :  { %v534_v34 = vpop.permute.xlu0 %533 }
 0xbb7   :  { %v536_v36 = vpop.permute.xlu1 %535  ;;  %v539_v37 = vmul.f32 %v1341_v30, %v534_v34 }
 0xbb8   :  { %v540_v38 = vmul.f32 %v1343_v35, %v536_v36 }
 0xbb9   :  { %543 = vrot.lane.b32.xlu0 %v539_v37, %s1442_s2 }
 0xbba   :  { %545 = vrot.lane.b32.xlu1 %v540_v38, %s1442_s2 }
 0xc2b   :  { %v544_v43 = vpop.permute.xlu0 %543 }
 0xc2c   :  { %v546_v44 = vpop.permute.xlu1 %545  ;;  %v1620_v45 = vadd.f32 %v544_v43, %v529_v41 }
 0xc2d   :  { %v1622_v46 = vadd.f32 %v546_v44, %v530_v42 }
 0xc2e   :  { %1344 = vtanh.f32 %v1620_v45  ;;  %v641_v24 = vrot.slane %v1620_v45, 7 }
 0xc2f   :  { %1346 = vtanh.f32 %v1622_v46  ;;  %v642_v25 = vrot.slane %v1622_v46, 7 }
 0xc38   :  { %v1345_v47 = vpop.eup %1344 }
 0xc39   :  { %v1347_v48 = vpop.eup %1346  ;;  %555 = vrot.lane.b32.xlu0 %v1345_v47, %s1438_s0 }
 0xc3a   :  { %557 = vrot.lane.b32.xlu1 %v1347_v48, %s1438_s0 }
 0xcab   :  { %v556_v49 = vpop.permute.xlu0 %555 }
 0xcac   :  { %v558_v50 = vpop.permute.xlu1 %557  ;;  %v561_v51 = vmul.f32 %v1341_v30, %v556_v49 }
 0xcad   :  { %v562_v52 = vmul.f32 %v1343_v35, %v558_v50 }
 0xcae   :  { %v563_v53 = vpack.c.bf16 %v561_v51, %v561_v51 }
 0xcaf   :  { %v564_v54 = vpack.c.bf16 %v562_v52, %v562_v52 }
 0xcb0   :  { %v567_v55 = vunpack.c.l.b16 %v563_v53 }
 0xcb1   :  { %v568_v56 = vunpack.c.l.b16 %v564_v54 }
 0xcb2   :  { %v569_v57 = vrot.slane %v567_v55, 4 }
 0xcb3   :  { %v570_v58 = vrot.slane %v568_v56, 3 }
 0xcb5   :  { %v571_v59 = vsel %vm91_vm1, %v570_v58, %v569_v57 }
 0xcb6   :  { %v572_v60 = vpack.c.b16 %v571_v59, %v571_v59 }
 0xcb8   :  { %573 = vrot.lane.b32.xlu0 %v572_v60, %s1442_s2 }
 0xd2a   :  { %v574_v61 = vpop.permute.xlu0 %573 }
 0xd2b   :  { %1219 = vmatmul.mubr.msk.bf16.vlgmr.msra.gmra.mrb[8].mxu0 %vm108_vm2, %v574_v61 }
 0xd2c   :  { %1231 = vmatpush3.bf16.msra.mxu0 %v1509_v31  ;;  %1234 = vmatprep.mubr.msk.bf16.mxu0 %vm1441_vm0, %v1440_v32 }
 0xd2d   :  { %1232 = vmatprep.subr.bf16.mxu0 %v1440_v32 }
 0xd30   :  { %1233 = vmatpush3.bf16.msra.mxu0 %v1518_v33 }
 0xd31   :  { %1246 = vmatprep.subr.bf16.mxu0 %v1440_v32 }
 0xdfe   :  { %v612_v62 = vpop.f32.mrb[8].mxu0 }
 0xdff   :  { %v619_v63 = vrot.slane %v612_v62, 3  ;;  %v620_v0 = vrot.slane %v612_v62, 4  ;;  %v1220_v1 = vpop.f32.mrb[9].mxu0 }
 0xe00   :  { %v615_v2 = vpop.f32.mrb[10].mxu0 }
 0xe01   :  { %v623_v3 = vadd.f32 %v619_v63, %v1495_v15  ;;  %v624_v5 = vadd.f32 %v620_v0, %v1489_v12  ;;  %v1221_v7 = vpop.f32.mrb[11].mxu0 }
 0xe03   :  { %1348 = vtanh.f32 %v623_v3  ;;  %v1139_v33 = vmul.f32 -1.442695, %v623_v3  ;;  %v1140_v9 = vmul.f32 -1.442695, %v624_v5 }
 0xe04   :  { %1350 = vtanh.f32 %v624_v5 }
 0xe05   :  { %1352 = vpow2.f32 %v1139_v33 }
 0xe06   :  { %1354 = vpow2.f32 %v1140_v9 }
 0xe0d   :  { %v1349_v31 = vpop.eup %1348 }
 0xe0e   :  { %v1351_v8 = vpop.eup %1350  ;;  %649 = vrot.lane.b32.xlu1 %v1349_v31, %s1438_s0 }
 0xe0f   :  { %651 = vrot.lane.b32.xlu0 %v1351_v8, %s1438_s0  ;;  %v1353_v11 = vpop.eup %1352 }
 0xe10   :  { %v1355_v14 = vpop.eup %1354  ;;  %v631_v16 = vadd.f32 1.0, %v1353_v11 }
 0xe11   :  { %v632_v17 = vadd.f32 1.0, %v1355_v14 }
 0xe12   :  { %1356 = vrcp.f32 %v631_v16 }
 0xe13   :  { %1358 = vrcp.f32 %v632_v17 }
 0xe1c   :  { %v1357_v18 = vpop.eup %1356 }
 0xe1d   :  { %v1359_v20 = vpop.eup %1358  ;;  %v645_v26 = vmul.f32 %v1357_v18, %v641_v24 }
 0xe1e   :  { %v646_v27 = vmul.f32 %v1359_v20, %v642_v25 }
 0xe80   :  { %v650_v19 = vpop.permute.xlu1 %649 }
 0xe81   :  { %v652_v21 = vpop.permute.xlu0 %651  ;;  %v655_v22 = vmul.f32 %v1357_v18, %v650_v19 }
 0xe82   :  { %v656_v23 = vmul.f32 %v1359_v20, %v652_v21 }
 0xe83   :  { %659 = vrot.lane.b32.xlu1 %v655_v22, %s1442_s2 }
 0xe84   :  { %661 = vrot.lane.b32.xlu0 %v656_v23, %s1442_s2 }
 0xef5   :  { %v660_v28 = vpop.permute.xlu1 %659 }
 0xef6   :  { %v662_v29 = vpop.permute.xlu0 %661  ;;  %v665_v30 = vadd.f32 %v660_v28, %v645_v26 }
 0xef7   :  { %v666_v34 = vadd.f32 %v662_v29, %v646_v27 }
 0xef8   :  { %1360 = vtanh.f32 %v665_v30  ;;  %v757_v33 = vrot.slane %v665_v30, 7 }
 0xef9   :  { %1362 = vtanh.f32 %v666_v34  ;;  %v758_v9 = vrot.slane %v666_v34, 7 }
 0xf02   :  { %v1361_v35 = vpop.eup %1360 }
 0xf03   :  { %v1363_v36 = vpop.eup %1362  ;;  %671 = vrot.lane.b32.xlu1 %v1361_v35, %s1438_s0 }
 0xf04   :  { %673 = vrot.lane.b32.xlu0 %v1363_v36, %s1438_s0 }
 0xf75   :  { %v672_v37 = vpop.permute.xlu1 %671 }
 0xf76   :  { %v674_v38 = vpop.permute.xlu0 %673  ;;  %v677_v39 = vmul.f32 %v1357_v18, %v672_v37 }
 0xf77   :  { %v678_v40 = vmul.f32 %v1359_v20, %v674_v38 }
 0xf78   :  { %v679_v41 = vpack.c.bf16 %v677_v39, %v677_v39 }
 0xf79   :  { %v680_v42 = vpack.c.bf16 %v678_v40, %v678_v40 }
 0xf7a   :  { %v683_v43 = vunpack.c.l.b16 %v679_v41 }
 0xf7b   :  { %v684_v44 = vunpack.c.l.b16 %v680_v42 }
 0xf7c   :  { %v685_v45 = vrot.slane %v683_v43, 5 }
 0xf7d   :  { %v686_v46 = vrot.slane %v684_v44, 4 }
 0xf7f   :  { %v687_v47 = vsel %vm91_vm1, %v686_v46, %v685_v45 }
 0xf80   :  { %v688_v48 = vpack.c.b16 %v687_v47, %v687_v47 }
 0xf82   :  { %689 = vrot.lane.b32.xlu1 %v688_v48, %s1442_s2 }
 0xff4   :  { %v690_v49 = vpop.permute.xlu1 %689 }
 0xff5   :  { %1227 = vmatmul.mubr.msk.bf16.vlgmr.msra.gmra.mrb[8].mxu1 %vm108_vm2, %v690_v49 }
 0xff6   :  { %1242 = vmatprep.mubr.msk.bf16.mxu1 %vm1441_vm0, %v1440_v32 }
0x10c8   :  { %v728_v50 = vpop.f32.mrb[8].mxu1 }
0x10c9   :  { %v735_v51 = vrot.slane %v728_v50, 2  ;;  %v736_v52 = vrot.slane %v728_v50, 3  ;;  %v1228_v53 = vpop.f32.mrb[9].mxu1  ;;  %v913_v50 = vsub.s32 2, %v1475_v4 }
0x10ca   :  { %v731_v54 = vpop.f32.mrb[10].mxu1 }
0x10cb   :  { %v739_v55 = vadd.f32 %v735_v51, %v1495_v15  ;;  %v740_v56 = vadd.f32 %v736_v52, %v1489_v12  ;;  %v1229_v57 = vpop.f32.mrb[11].mxu1 }
0x10cd   :  { %1364 = vtanh.f32 %v739_v55  ;;  %v1142_v60 = vmul.f32 -1.442695, %v739_v55  ;;  %v1143_v61 = vmul.f32 -1.442695, %v740_v56 }
0x10ce   :  { %1366 = vtanh.f32 %v740_v56 }
0x10cf   :  { %1368 = vpow2.f32 %v1142_v60 }
0x10d0   :  { %1370 = vpow2.f32 %v1143_v61 }
0x10d7   :  { %v1365_v58 = vpop.eup %1364 }
0x10d8   :  { %v1367_v59 = vpop.eup %1366  ;;  %765 = vrot.lane.b32.xlu0 %v1365_v58, %s1438_s0 }
0x10d9   :  { %767 = vrot.lane.b32.xlu1 %v1367_v59, %s1438_s0  ;;  %v1369_v62 = vpop.eup %1368 }
0x10da   :  { %v1371_v63 = vpop.eup %1370  ;;  %v747_v0 = vadd.f32 1.0, %v1369_v62 }
0x10db   :  { %v748_v1 = vadd.f32 1.0, %v1371_v63 }
0x10dc   :  { %1372 = vrcp.f32 %v747_v0 }
0x10dd   :  { %1374 = vrcp.f32 %v748_v1 }
0x10e6   :  { %v1373_v2 = vpop.eup %1372 }
0x10e7   :  { %v1375_v5 = vpop.eup %1374  ;;  %v761_v11 = vmul.f32 %v1373_v2, %v757_v33 }
0x10e8   :  { %v762_v14 = vmul.f32 %v1375_v5, %v758_v9 }
0x114a   :  { %v766_v3 = vpop.permute.xlu0 %765 }
0x114b   :  { %v768_v7 = vpop.permute.xlu1 %767  ;;  %v771_v31 = vmul.f32 %v1373_v2, %v766_v3 }
0x114c   :  { %v772_v8 = vmul.f32 %v1375_v5, %v768_v7 }
0x114d   :  { %775 = vrot.lane.b32.xlu0 %v771_v31, %s1442_s2 }
0x114e   :  { %777 = vrot.lane.b32.xlu1 %v772_v8, %s1442_s2 }
0x11bf   :  { %v776_v16 = vpop.permute.xlu0 %775 }
0x11c0   :  { %v778_v17 = vpop.permute.xlu1 %777  ;;  %v1658_v18 = vadd.f32 %v776_v16, %v761_v11 }
0x11c1   :  { %v1660_v19 = vadd.f32 %v778_v17, %v762_v14 }
0x11c2   :  { %1376 = vtanh.f32 %v1658_v18  ;;  %v873_v8 = vrot.slane %v1658_v18, 7 }
0x11c3   :  { %1378 = vtanh.f32 %v1660_v19  ;;  %v874_v33 = vrot.slane %v1660_v19, 7 }
0x11cc   :  { %v1377_v20 = vpop.eup %1376 }
0x11cd   :  { %v1379_v21 = vpop.eup %1378  ;;  %787 = vrot.lane.b32.xlu0 %v1377_v20, %s1438_s0 }
0x11ce   :  { %789 = vrot.lane.b32.xlu1 %v1379_v21, %s1438_s0 }
0x123f   :  { %v788_v22 = vpop.permute.xlu0 %787 }
0x1240   :  { %v790_v23 = vpop.permute.xlu1 %789  ;;  %v793_v24 = vmul.f32 %v1373_v2, %v788_v22 }
0x1241   :  { %v794_v25 = vmul.f32 %v1375_v5, %v790_v23 }
0x1242   :  { %v795_v26 = vpack.c.bf16 %v793_v24, %v793_v24 }
0x1243   :  { %v796_v27 = vpack.c.bf16 %v794_v25, %v794_v25 }
0x1244   :  { %v799_v28 = vunpack.c.l.b16 %v795_v26 }
0x1245   :  { %v800_v29 = vunpack.c.l.b16 %v796_v27 }
0x1246   :  { %v801_v30 = vrot.slane %v799_v28, 6  ;;  %v1264_v28 = vld [vmem:[%s1730_s3] sm:$0xff]  }
0x1247   :  { %v802_v34 = vrot.slane %v800_v29, 5  ;;  %v1265_v29 = vld [vmem:[%s1730_s3 + $0x10] sm:$0xff]  }
0x1248   :  { %1239 = vmatpush3.bf16.msra.mxu1 %v1265_v29 }
0x1249   :  { %v803_v35 = vsel %vm91_vm1, %v802_v34, %v801_v30  ;;  %v1266_v34 = vld [vmem:[%s1730_s3 + $0x8] sm:$0xff]   ;;  %1240 = vmatprep.subr.bf16.mxu1 %v1440_v32 }
0x124a   :  { %v804_v36 = vpack.c.b16 %v803_v35, %v803_v35  ;;  %v1267_v35 = vld [vmem:[%s1730_s3 + $0x18] sm:$0xff]  }
0x124c   :  { %805 = vrot.lane.b32.xlu0 %v804_v36, %s1442_s2  ;;  %1241 = vmatpush3.bf16.msra.mxu1 %v1267_v35 }
0x12be   :  { %v806_v37 = vpop.permute.xlu0 %805 }
0x12bf   :  { %1235 = vmatmul.mubr.msk.bf16.vlgmr.msra.gmra.mrb[12].mxu0 %vm108_vm2, %v806_v37 }
0x12c0   :  { %1250 = vmatprep.mubr.msk.bf16.mxu0 %vm1441_vm0, %v1440_v32  ;;  %1247 = vmatpush3.bf16.msra.mxu0 %v1264_v28 }
0x12c1   :  { %1248 = vmatprep.subr.bf16.mxu0 %v1440_v32 }
0x12c4   :  { %1249 = vmatpush3.bf16.msra.mxu0 %v1266_v34 }
0x1392   :  { %v844_v38 = vpop.f32.mrb[12].mxu0 }
0x1393   :  { %v851_v39 = vrot.slane %v844_v38, 1  ;;  %v852_v40 = vrot.slane %v844_v38, 2  ;;  %v1236_v41 = vpop.f32.mrb[13].mxu0 }
0x1394   :  { %v847_v42 = vpop.f32.mrb[14].mxu0 }
0x1395   :  { %v855_v43 = vadd.f32 %v851_v39, %v1495_v15  ;;  %v856_v44 = vadd.f32 %v852_v40, %v1489_v12  ;;  %v1237_v45 = vpop.f32.mrb[15].mxu0  ;;  %v919_v15 = vsub.s32 3, %v1475_v4  ;;  %v914_v12 = vrot.slane %v1481_v6, %v913_v50 }
0x1397   :  { %1380 = vtanh.f32 %v855_v43  ;;  %v1145_v48 = vmul.f32 -1.442695, %v855_v43  ;;  %v1146_v49 = vmul.f32 -1.442695, %v856_v44  ;;  %v915_v55 = vmul.f32 %v914_v12, %v1491_v13 }
0x1398   :  { %1382 = vtanh.f32 %v856_v44  ;;  %v916_v56 = vmul.f32 %v914_v12, %v1486_v10  ;;  %v920_v57 = vrot.slane %v1481_v6, %v919_v15 }
0x1399   :  { %1384 = vpow2.f32 %v1145_v48 }
0x139a   :  { %1386 = vpow2.f32 %v1146_v49  ;;  %v921_v58 = vadd.f32 %v920_v57, %v915_v55  ;;  %v922_v59 = vadd.f32 %v920_v57, %v916_v56 }
0x139c   :  { %v1147_v6 = vmul.f32 -1.442695, %v921_v58  ;;  %v1148_v2 = vmul.f32 -1.442695, %v922_v59 }
0x13a1   :  { %v1381_v46 = vpop.eup %1380 }
0x13a2   :  { %v1383_v47 = vpop.eup %1382  ;;  %881 = vrot.lane.b32.xlu1 %v1381_v46, %s1438_s0 }
0x13a3   :  { %883 = vrot.lane.b32.xlu0 %v1383_v47, %s1438_s0  ;;  %v1385_v51 = vpop.eup %1384 }
0x13a4   :  { %v1387_v52 = vpop.eup %1386  ;;  %v863_v53 = vadd.f32 1.0, %v1385_v51 }
0x13a5   :  { %v864_v54 = vadd.f32 1.0, %v1387_v52 }
0x13a6   :  { %1388 = vrcp.f32 %v863_v53 }
0x13a7   :  { %1390 = vrcp.f32 %v864_v54 }
0x13a8   :  { %1392 = vtanh.f32 %v921_v58 }
0x13a9   :  { %1394 = vtanh.f32 %v922_v59  ;;  %v1103_v59 = vsub.s32 4, %v1475_v4 }
0x13aa   :  { %1396 = vpow2.f32 %v1147_v6 }
0x13ab   :  { %1398 = vpow2.f32 %v1148_v2 }
0x13b0   :  { %v1389_v60 = vpop.eup %1388 }
0x13b1   :  { %v1391_v62 = vpop.eup %1390  ;;  %v877_v9 = vmul.f32 %v1389_v60, %v873_v8 }
0x13b2   :  { %v1393_v13 = vpop.eup %1392  ;;  %v878_v11 = vmul.f32 %v1391_v62, %v874_v33 }
0x13b3   :  { %v1395_v10 = vpop.eup %1394 }
0x13b4   :  { %v1397_v3 = vpop.eup %1396 }
0x13b5   :  { %v1399_v5 = vpop.eup %1398  ;;  %v929_v7 = vadd.f32 1.0, %v1397_v3 }
0x13b6   :  { %v930_v31 = vadd.f32 1.0, %v1399_v5 }
0x13b7   :  { %1400 = vrcp.f32 %v929_v7 }
0x13b8   :  { %1402 = vrcp.f32 %v930_v31 }
0x13c1   :  { %v1401_v21 = vpop.eup %1400 }
0x13c2   :  { %v1403_v23 = vpop.eup %1402 }
0x1414   :  { %v882_v61 = vpop.permute.xlu1 %881 }
0x1415   :  { %v884_v63 = vpop.permute.xlu0 %883  ;;  %v887_v0 = vmul.f32 %v1389_v60, %v882_v61 }
0x1416   :  { %v888_v1 = vmul.f32 %v1391_v62, %v884_v63 }
0x1417   :  { %891 = vrot.lane.b32.xlu1 %v887_v0, %s1442_s2  ;;  %v1412_v0 = vld [vmem:[%s1728_s1] sm:$0xff] }
0x1418   :  { %893 = vrot.lane.b32.xlu0 %v888_v1, %s1442_s2  ;;  %v1104_v1 = vrot.slane %v1412_v0, %v1103_v59 }
0x141b   :  { %939 = vrot.lane.b32.xlu1 %v1393_v13, %s1438_s0 }
0x141c   :  { %941 = vrot.lane.b32.xlu0 %v1395_v10, %s1438_s0 }
0x1489   :  { %v892_v14 = vpop.permute.xlu1 %891 }
0x148a   :  { %v894_v16 = vpop.permute.xlu0 %893  ;;  %v897_v17 = vadd.f32 %v892_v14, %v877_v9 }
0x148b   :  { %v898_v20 = vadd.f32 %v894_v16, %v878_v11 }
0x148c   :  { %1404 = vtanh.f32 %v897_v17 }
0x148d   :  { %1406 = vtanh.f32 %v898_v20  ;;  %v940_v22 = vpop.permute.xlu1 %939 }
0x148e   :  { %v942_v24 = vpop.permute.xlu0 %941  ;;  %v945_v25 = vmul.f32 %v1401_v21, %v940_v22 }
0x148f   :  { %v946_v26 = vmul.f32 %v1403_v23, %v942_v24 }
0x1490   :  { %1408 = vtanh.f32 %v945_v25 }
0x1491   :  { %1410 = vtanh.f32 %v946_v26 }
0x1496   :  { %v1405_v27 = vpop.eup %1404 }
0x1497   :  { %v1407_v18 = vpop.eup %1406  ;;  %903 = vrot.lane.b32.xlu1 %v1405_v27, %s1438_s0 }
0x1498   :  { %905 = vrot.lane.b32.xlu0 %v1407_v18, %s1438_s0 }
0x149a   :  { %v1409_v19 = vpop.eup %1408 }
0x149b   :  { %v1411_v30 = vpop.eup %1410  ;;  %951 = vrot.lane.b32.xlu1 %v1409_v19, %s1439_s21 }
0x149c   :  { %953 = vrot.lane.b32.xlu0 %v1411_v30, %s1439_s21 }
0x1509   :  { %v904_v36 = vpop.permute.xlu1 %903 }
0x150a   :  { %v906_v37 = vpop.permute.xlu0 %905  ;;  %v909_v38 = vmul.f32 %v1389_v60, %v904_v36 }
0x150b   :  { %v910_v39 = vmul.f32 %v1391_v62, %v906_v37 }
0x150c   :  { %v967_v40 = vpack.c.bf16 %v909_v38, %v909_v38 }
0x150d   :  { %v968_v41 = vpack.c.bf16 %v910_v39, %v910_v39  ;;  %v952_v42 = vpop.permute.xlu1 %951 }
0x150e   :  { %v1038_v43 = vunpack.c.l.b16 %v967_v40  ;;  %v954_v44 = vpop.permute.xlu0 %953  ;;  %v957_v45 = vmul.f32 %v1401_v21, %v952_v42 }
0x150f   :  { %v1039_v46 = vunpack.c.l.b16 %v968_v41  ;;  %v958_v47 = vmul.f32 %v1403_v23, %v954_v44 }
0x1510   :  { %v1040_v48 = vrot.slane %v1038_v43, 7  ;;  %v969_v32 = vpack.c.bf16 %v957_v45, %v957_v45 }
0x1511   :  { %v1041_v49 = vrot.slane %v1039_v46, 6  ;;  %v970_v50 = vpack.c.bf16 %v958_v47, %v958_v47 }
0x1512   :  { %v973_v51 = vunpack.c.l.b16 %v969_v32 }
0x1513   :  { %v974_v52 = vunpack.c.l.b16 %v970_v50  ;;  %v1042_v15 = vsel %vm91_vm1, %v1041_v49, %v1040_v48 }
0x1514   :  { %v975_v12 = vrot.slane %v973_v51, 7  ;;  %v1043_v53 = vpack.c.b16 %v1042_v15, %v1042_v15 }
0x1515   :  { %v976_v54 = vrot.slane %v974_v52, 6 }
0x1516   :  { %1044 = vrot.lane.b32.xlu0 %v1043_v53, %s1442_s2 }
0x1517   :  { %v977_v55 = vsel %vm91_vm1, %v976_v54, %v975_v12 }
0x1518   :  { %v978_v56 = vpack.c.b16 %v977_v55, %v977_v55 }
0x151a   :  { %979 = vrot.lane.b32.xlu1 %v978_v56, %s1442_s2 }
0x1588   :  { %v1045_v57 = vpop.permute.xlu0 %1044 }
0x1589   :  { %1251 = vmatmul.mubr.msk.bf16.vlgmr.msra.gmra.mrb[16].mxu0 %vm108_vm2, %v1045_v57 }
0x158c   :  { %v980_v58 = vpop.permute.xlu1 %979 }
0x158d   :  { %1243 = vmatmul.mubr.msk.bf16.vlgmr.msra.gmra.mrb[12].mxu1 %vm108_vm2, %v980_v58 }
0x165c   :  { %v1095_v60 = vpop.f32.mrb[16].mxu0 }
0x165d   :  { %v1252_v61 = vpop.f32.mrb[17].mxu0 }
0x165e   :  { %v1098_v62 = vpop.f32.mrb[18].mxu0 }
0x165f   :  { %v1253_v63 = vpop.f32.mrb[19].mxu0 }
0x1660   :  { %v1030_v13 = vpop.f32.mrb[12].mxu1 }
0x1661   :  { %v1096_v10 = vadd.f32 %v1095_v60, %v1030_v13  ;;  %v1244_v6 = vpop.f32.mrb[13].mxu1 }
0x1662   :  { %v1033_v2 = vpop.f32.mrb[14].mxu1 }
0x1663   :  { %v1105_v3 = vadd.f32 %v1104_v1, %v1096_v10  ;;  %v1245_v5 = vpop.f32.mrb[15].mxu1 }
0x1665   :  { %1107 = vst.msk [vmem:[#allocation2] sm:$0x3] %vm1106_vm3, %v1105_v3 }
0x1666   :  { %1424 = shalt.err (!%p1421_p4)
}
0x1667   :  { %s1425_s13 = scalar_lea.hbm %s1731_s4, 32 }
0x1668   :  { %p1426_p5 = scmp.ne.s32.totalorder %s1731_s4, %s1425_s13  ;;  %p1429_p6 = scmp.lt.u32.totalorder %s1425_s13, %s1731_s4 }
0x166a   :  { %p1431_p7 = pnand %p1429_p6, %p1426_p5 }
0x166c   :  { %1434 = shalt.err (!%p1431_p7)
}
0x166d   :  { %1117 = dma.vmem_to_hbm [thread:$0]  %s1115_s10, 32, %s1731_s4, [#allocation3]  }
0x166e   :  { %1435 = dma.done.wait [#allocation3], 32  }
0x166f   :  { %1436 = vsyncadd [#allocation3], 4294967264 }
0x1670   :  { %1121 = vsyncpa [#allocation3], 1 }

</bundles_post_ra>
